<compile_context>
chip_gen: v7x
topology: tpu7x:2x2x1
jax: 0.10.0
libtpu: 0.0.40
codegen_flags: <defaults>
</compile_context>

<pallas_src>
import jax
import jax.numpy as jnp
from jax.experimental import pallas as pl
from jax.experimental.pallas import tpu as pltpu

LANE = 128
SUBLANE = 8


def _round_up(n, m):
    return ((n + m - 1) // m) * m


def qnet_kernel(x_ref, w1_ref, b1_ref, w2_ref, b2_ref, w3_ref, b3_ref, o_ref):
    cdt = w1_ref.dtype            # matmul-input dtype (bf16 or f32)
    edt1 = b1_ref.dtype           # epilogue dtype for fc1/fc2 (bf16 on v6e/v7x path, else f32)
    edt2 = b2_ref.dtype

    # fc1 + relu: in-kernel cast of the f32 x tile, MXU matmul, bias+ReLU in epilogue dtype.
    x = x_ref[...].astype(cdt)
    h1 = jnp.dot(x, w1_ref[...], preferred_element_type=edt1) + b1_ref[...]
    h1 = jnp.maximum(h1, jnp.zeros((), edt1))

    # fc2 + relu ( .astype is a no-op when epilogue dtype == compute dtype ).
    h2 = jnp.dot(h1.astype(cdt), w2_ref[...], preferred_element_type=edt2) + b2_ref[...]
    h2 = jnp.maximum(h2, jnp.zeros((), edt2))

    # fc3: always f32 accumulation + f32 bias add. Compute stays lane-dense (A_pad wide);
    # only the first num_actions columns are stored (narrow HBM writeback).
    out = jnp.dot(h2.astype(cdt), w3_ref[...], preferred_element_type=jnp.float32)
    out = out + b3_ref[...]
    o_ref[...] = out[:, : o_ref.shape[-1]].astype(o_ref.dtype)


def qnetwork_forward(x, params, *, tile_b=4096, compute_dtype=jnp.bfloat16,
                     epilogue_dtype=None, out_dtype=jnp.float32):
    """x: [B, num_states] float32. params: w1,b1,w2,b2,w3,b3 with weights in [in, out] layout."""
    if epilogue_dtype is None:
        epilogue_dtype = compute_dtype

    w1, b1 = params["w1"], params["b1"]
    w2, b2 = params["w2"], params["b2"]
    w3, b3 = params["w3"], params["b3"]

    B, S = x.shape
    H = w1.shape[1]
    A = w3.shape[1]
    H_pad = _round_up(H, LANE)
    A_pad = _round_up(A, LANE)

    # Adaptive batch tiling: pick the number of grid steps first, then a sublane-aligned tb,
    # so padding waste is bounded by one small remainder (not up to a multiple of tile_b).
    n_steps = max(1, -(-B // max(tile_b, SUBLANE)))
    tb = _round_up(-(-B // n_steps), SUBLANE)
    B_pad = n_steps * tb
    grid = (n_steps,)

    # One-time wrapper-side padding/cast of the tiny weights/biases only; x stays f32.
    def pad2(a, r, c):
        return jnp.pad(a, ((0, r - a.shape[0]), (0, c - a.shape[1])))

    x_p = jnp.pad(x, ((0, B_pad - B), (0, 0))) if B_pad != B else x
    w1_p = pad2(w1, S, H_pad).astype(compute_dtype)
    w2_p = pad2(w2, H_pad, H_pad).astype(compute_dtype)
    w3_p = pad2(w3, H_pad, A_pad).astype(compute_dtype)
    b1_p = pad2(b1, 1, H_pad).astype(epilogue_dtype)
    b2_p = pad2(b2, 1, H_pad).astype(epilogue_dtype)
    b3_p = pad2(b3, 1, A_pad).astype(jnp.float32)

    w_itemsize = jnp.dtype(compute_dtype).itemsize
    weight_bytes = ((w1_p.size + w2_p.size + w3_p.size) * w_itemsize
                    + (b1_p.size + b2_p.size) * jnp.dtype(epilogue_dtype).itemsize
                    + b3_p.size * 4)
    cost = pl.CostEstimate(
        flops=2 * B_pad * (S * H_pad + H_pad * H_pad + H_pad * A_pad),
        transcendentals=0,
        bytes_accessed=(B_pad * S * 4                       # x read (f32)
                        + weight_bytes                       # resident weights (once)
                        + B_pad * A * jnp.dtype(out_dtype).itemsize),  # narrow output write
    )

    const = lambda i: (0, 0)  # weights/biases: same block every grid step -> VMEM-resident
    out_pad = pl.pallas_call(
        qnet_kernel,
        out_shape=jax.ShapeDtypeStruct((B_pad, A), out_dtype),
        grid=grid,
        in_specs=[
            pl.BlockSpec((tb, S), lambda i: (i, 0)),        # x tile (pipelined over batch)
            pl.BlockSpec((S, H_pad), const),                # w1
            pl.BlockSpec((1, H_pad), const),                # b1
            pl.BlockSpec((H_pad, H_pad), const),            # w2
            pl.BlockSpec((1, H_pad), const),                # b2
            pl.BlockSpec((H_pad, A_pad), const),            # w3
            pl.BlockSpec((1, A_pad), const),                # b3
        ],
        out_specs=pl.BlockSpec((tb, A), lambda i: (i, 0)),  # narrow (num_actions-wide) store
        compiler_params=pltpu.CompilerParams(
            dimension_semantics=("parallel",)),
        cost_estimate=cost,
    )(x_p, w1_p, b1_p, w2_p, b2_p, w3_p, b3_p)

    return out_pad[:B] if B_pad != B else out_pad


def init_params(key, num_states, num_actions, hidden=64):
    # PyTorch nn.Linear default init: U(-1/sqrt(fan_in), 1/sqrt(fan_in)).
    keys = jax.random.split(key, 6)

    def lin(kw, kb, fan_in, fan_out):
        bound = 1.0 / jnp.sqrt(jnp.float32(fan_in))
        w = jax.random.uniform(kw, (fan_in, fan_out), jnp.float32, -bound, bound)
        b = jax.random.uniform(kb, (1, fan_out), jnp.float32, -bound, bound)
        return w, b

    w1, b1 = lin(keys[0], keys[1], num_states, hidden)
    w2, b2 = lin(keys[2], keys[3], hidden, hidden)
    w3, b3 = lin(keys[4], keys[5], hidden, num_actions)
    return {"w1": w1, "b1": b1, "w2": w2, "b2": b2, "w3": w3, "b3": b3}


def qnetwork_ref(x, p):
    h1 = jnp.maximum(x @ p["w1"] + p["b1"], 0.0)
    h2 = jnp.maximum(h1 @ p["w2"] + p["b2"], 0.0)
    return h2 @ p["w3"] + p["b3"]


if __name__ == "__main__":
    num_states, num_actions = 16, 4
    key = jax.random.PRNGKey(0)
    kx, kp, kx2 = jax.random.split(key, 3)
    params = init_params(kp, num_states, num_actions)

    # Case 1: small batch, f32 compute path (tight tolerance).
    batch = 8
    x = jax.random.normal(kx, (batch, num_states), jnp.float32)
    out_f32 = qnetwork_forward(x, params, compute_dtype=jnp.float32)
    jax.block_until_ready(out_f32)
    ref = qnetwork_ref(x, params)
    assert out_f32.shape == (batch, num_actions)
    assert jnp.allclose(out_f32, ref, atol=1e-4, rtol=1e-4), "f32 mismatch vs reference"

    # Case 2: ragged batch with a multi-step grid, bf16 matmuls + bf16 epilogue (loose tol).
    batch2 = 37
    x2 = jax.random.normal(kx2, (batch2, num_states), jnp.float32)
    out_bf16 = qnetwork_forward(x2, params, tile_b=16, compute_dtype=jnp.bfloat16)
    jax.block_until_ready(out_bf16)
    ref2 = qnetwork_ref(x2, params)
    assert out_bf16.shape == (batch2, num_actions)
    assert jnp.allclose(out_bf16, ref2, atol=5e-2, rtol=5e-2), "bf16 mismatch vs reference"

    # Case 3: bf16 matmuls with f32 epilogue (v5e-friendly config), default large tile.
    out_mix = qnetwork_forward(x2, params, compute_dtype=jnp.bfloat16,
                               epilogue_dtype=jnp.float32)
    jax.block_until_ready(out_mix)
    assert out_mix.shape == (batch2, num_actions)
    assert jnp.allclose(out_mix, ref2, atol=5e-2, rtol=5e-2), "mixed mismatch vs reference"

    print("KERNEL_OK")
</pallas_src>

<mosaic_0001>
module attributes {stable_mosaic.version = 11 : i64} {
  func.func @qnet_kernel(%arg0: i32, %arg1: memref<8x16xf32, #tpu.memory_space<vmem>>, %arg2: memref<16x128xf32, #tpu.memory_space<vmem>>, %arg3: memref<1x128xf32, #tpu.memory_space<vmem>>, %arg4: memref<128x128xf32, #tpu.memory_space<vmem>>, %arg5: memref<1x128xf32, #tpu.memory_space<vmem>>, %arg6: memref<128x128xf32, #tpu.memory_space<vmem>>, %arg7: memref<1x128xf32, #tpu.memory_space<vmem>>, %arg8: memref<8x4xf32, #tpu.memory_space<vmem>>) attributes {dimension_semantics = [#tpu.dimension_semantics<parallel>], iteration_bounds = array<i64: 1>, scalar_prefetch = 0 : i64, scratch_operands = 0 : i64, tpu.core_type = #tpu.core_type<tc>, window_params = [{transform_indices = @transform_0, window_bounds = array<i64: 8, 16>}, {pipeline_mode = #tpu.pipeline_mode<synchronous>, transform_indices = @transform_1, window_bounds = array<i64: 16, 128>}, {pipeline_mode = #tpu.pipeline_mode<synchronous>, transform_indices = @transform_2, window_bounds = array<i64: 1, 128>}, {pipeline_mode = #tpu.pipeline_mode<synchronous>, transform_indices = @transform_3, window_bounds = array<i64: 128, 128>}, {pipeline_mode = #tpu.pipeline_mode<synchronous>, transform_indices = @transform_4, window_bounds = array<i64: 1, 128>}, {pipeline_mode = #tpu.pipeline_mode<synchronous>, transform_indices = @transform_5, window_bounds = array<i64: 128, 128>}, {pipeline_mode = #tpu.pipeline_mode<synchronous>, transform_indices = @transform_6, window_bounds = array<i64: 1, 128>}, {transform_indices = @transform_7, window_bounds = array<i64: 8, 4>}]} {
    %c0 = arith.constant 0 : index
    %c0_0 = arith.constant 0 : index
    %0 = vector.load %arg1[%c0, %c0_0] : memref<8x16xf32, #tpu.memory_space<vmem>>, vector<8x16xf32>
    %c0_1 = arith.constant 0 : index
    %c0_2 = arith.constant 0 : index
    %1 = vector.load %arg2[%c0_1, %c0_2] : memref<16x128xf32, #tpu.memory_space<vmem>>, vector<16x128xf32>
    %cst = arith.constant dense<0.000000e+00> : vector<8x128xf32>
    %2 = tpu.matmul %0, %1, %cst {dimension_numbers = #tpu.dot_dimension_numbers<[1], [0], [0], [1], [0, 0, 1, 1], [], []>} : vector<8x16xf32>, vector<16x128xf32>, vector<8x128xf32> -> vector<8x128xf32>
    %c0_3 = arith.constant 0 : index
    %c0_4 = arith.constant 0 : index
    %3 = vector.load %arg3[%c0_3, %c0_4] : memref<1x128xf32, #tpu.memory_space<vmem>>, vector<1x128xf32>
    %4 = vector.broadcast %3 : vector<1x128xf32> to vector<8x128xf32>
    %5 = arith.addf %2, %4 : vector<8x128xf32>
    %cst_5 = arith.constant 0.000000e+00 : f32
    %6 = vector.broadcast %cst_5 : f32 to vector<8x128xf32>
    %7 = arith.maximumf %5, %6 : vector<8x128xf32>
    %c0_6 = arith.constant 0 : index
    %c0_7 = arith.constant 0 : index
    %8 = vector.load %arg4[%c0_6, %c0_7] : memref<128x128xf32, #tpu.memory_space<vmem>>, vector<128x128xf32>
    %cst_8 = arith.constant dense<0.000000e+00> : vector<8x128xf32>
    %9 = tpu.matmul %7, %8, %cst_8 {dimension_numbers = #tpu.dot_dimension_numbers<[1], [0], [0], [1], [0, 0, 1, 1], [], []>} : vector<8x128xf32>, vector<128x128xf32>, vector<8x128xf32> -> vector<8x128xf32>
    %c0_9 = arith.constant 0 : index
    %c0_10 = arith.constant 0 : index
    %10 = vector.load %arg5[%c0_9, %c0_10] : memref<1x128xf32, #tpu.memory_space<vmem>>, vector<1x128xf32>
    %11 = vector.broadcast %10 : vector<1x128xf32> to vector<8x128xf32>
    %12 = arith.addf %9, %11 : vector<8x128xf32>
    %cst_11 = arith.constant 0.000000e+00 : f32
    %13 = vector.broadcast %cst_11 : f32 to vector<8x128xf32>
    %14 = arith.maximumf %12, %13 : vector<8x128xf32>
    %c0_12 = arith.constant 0 : index
    %c0_13 = arith.constant 0 : index
    %15 = vector.load %arg6[%c0_12, %c0_13] : memref<128x128xf32, #tpu.memory_space<vmem>>, vector<128x128xf32>
    %cst_14 = arith.constant dense<0.000000e+00> : vector<8x128xf32>
    %16 = tpu.matmul %14, %15, %cst_14 {dimension_numbers = #tpu.dot_dimension_numbers<[1], [0], [0], [1], [0, 0, 1, 1], [], []>} : vector<8x128xf32>, vector<128x128xf32>, vector<8x128xf32> -> vector<8x128xf32>
    %c0_15 = arith.constant 0 : index
    %c0_16 = arith.constant 0 : index
    %17 = vector.load %arg7[%c0_15, %c0_16] : memref<1x128xf32, #tpu.memory_space<vmem>>, vector<1x128xf32>
    %18 = vector.broadcast %17 : vector<1x128xf32> to vector<8x128xf32>
    %19 = arith.addf %16, %18 : vector<8x128xf32>
    %20 = vector.extract_strided_slice %19 {offsets = [0, 0], sizes = [8, 4], strides = [1, 1]} : vector<8x128xf32> to vector<8x4xf32>
    %c0_17 = arith.constant 0 : index
    %c0_18 = arith.constant 0 : index
    %21 = vector.load %arg8[%c0_17, %c0_18] : memref<8x4xf32, #tpu.memory_space<vmem>>, vector<8x4xf32>
    tpu.vector_store %arg8[%c0_17, %c0_18], %20 {strides = array<i32>} : memref<8x4xf32, #tpu.memory_space<vmem>>, vector<8x4xf32>,
    return
  }
  func.func @transform_0(%arg0: i32) -> (i32, i32) {
    %c0_i32 = arith.constant 0 : i32
    %c0_i32_0 = arith.constant 0 : i32
    return %arg0, %c0_i32 : i32, i32
  }
  func.func @transform_1(%arg0: i32) -> (i32, i32) {
    %c0_i32 = arith.constant 0 : i32
    %c0_i32_0 = arith.constant 0 : i32
    %c0_i32_1 = arith.constant 0 : i32
    return %c0_i32, %c0_i32_0 : i32, i32
  }
  func.func @transform_2(%arg0: i32) -> (i32, i32) {
    %c0_i32 = arith.constant 0 : i32
    %c0_i32_0 = arith.constant 0 : i32
    %c0_i32_1 = arith.constant 0 : i32
    return %c0_i32, %c0_i32_0 : i32, i32
  }
  func.func @transform_3(%arg0: i32) -> (i32, i32) {
    %c0_i32 = arith.constant 0 : i32
    %c0_i32_0 = arith.constant 0 : i32
    %c0_i32_1 = arith.constant 0 : i32
    return %c0_i32, %c0_i32_0 : i32, i32
  }
  func.func @transform_4(%arg0: i32) -> (i32, i32) {
    %c0_i32 = arith.constant 0 : i32
    %c0_i32_0 = arith.constant 0 : i32
    %c0_i32_1 = arith.constant 0 : i32
    return %c0_i32, %c0_i32_0 : i32, i32
  }
  func.func @transform_5(%arg0: i32) -> (i32, i32) {
    %c0_i32 = arith.constant 0 : i32
    %c0_i32_0 = arith.constant 0 : i32
    %c0_i32_1 = arith.constant 0 : i32
    return %c0_i32, %c0_i32_0 : i32, i32
  }
  func.func @transform_6(%arg0: i32) -> (i32, i32) {
    %c0_i32 = arith.constant 0 : i32
    %c0_i32_0 = arith.constant 0 : i32
    %c0_i32_1 = arith.constant 0 : i32
    return %c0_i32, %c0_i32_0 : i32, i32
  }
  func.func @transform_7(%arg0: i32) -> (i32, i32) {
    %c0_i32 = arith.constant 0 : i32
    %c0_i32_0 = arith.constant 0 : i32
    return %arg0, %c0_i32 : i32, i32
  }
}

</mosaic_0001>

<bundles_post_ra>
// kernel: tpu_custom_call.1
= control target key start
LH: loop header
LB: loop body
LE: loop exit
PB: predicated region body
PF: predicated region fallthrough
CT: control target
= control target key end

     0   :  { %12 = vsyncpa [#allocation3], 0  ;;  %s770_s0 = inlined_call_operand.hbm [shape: f32[8,16], index: 0, kind: input, shape index: {}]   ;;  %s771_s1 = inlined_call_operand.hbm [shape: f32[16,128], index: 1, kind: input, shape index: {}]   ;;  %s772_s2 = inlined_call_operand.vmem [shape: f32[1,128], index: 2, kind: input, shape index: {}]   ;;  %s773_s3 = inlined_call_operand.hbm [shape: f32[128,128], index: 3, kind: input, shape index: {}]   ;;  %s774_s4 = inlined_call_operand.vmem [shape: f32[1,128], index: 4, kind: input, shape index: {}]   ;;  %s775_s5 = inlined_call_operand.hbm [shape: f32[128,128], index: 5, kind: input, shape index: {}]   ;;  %s776_s6 = inlined_call_operand.vmem [shape: f32[1,128], index: 6, kind: input, shape index: {}]   ;;  %s777_s7 = inlined_call_operand.vmem [shape: f32[8,4], index: 7, kind: output, shape index: {}]  }
   0x1   :  { %13 = vsyncpa [#allocation5], 0 }
   0x2   :  { %14 = vsyncpa [#allocation8], 0  ;;  %s632_s24 = smov [#allocation4]   ;;  %s538_s28 = scalar_lea.hbm %s771_s1, 256 }
   0x3   :  { %s30_s25 = sshll.u32 %s632_s24, 4  ;;  %p539_p0 = scmp.ne.s32.totalorder %s771_s1, %s538_s28  ;;  %s31_s25 = int_to_ptr.vmem [resolvable:$true] %s30_s25 }
   0x4   :  { %p542_p1 = scmp.lt.u32.totalorder %s538_s28, %s771_s1 }
   0x6   :  { %p544_p2 = pnand %p542_p1, %p539_p0 }
   0x8   :  { %547 = shalt.err (!%p544_p2)
}
   0x9   :  { %s548_s10 = scalar_lea.vmem %s31_s25, 256  ;;  %p553_p4 = scmp.lt.s32.totalorder %s31_s25, %s31_s25 }
   0xa   :  { %p549_p3 = scmp.ne.s32.totalorder %s31_s25, %s548_s10  ;;  %p554_p5 = scmp.lt.s32.totalorder %s548_s10, %s548_s10 }
   0xc   :  { %p555_p6 = por %p554_p5, %p553_p4 }
   0xe   :  { %p556_p7 = pnand %p555_p6, %p549_p3 }
  0x10   :  { %559 = shalt.err (!%p556_p7)
}
  0x11   :  { %s633_s11 = smov 128   ;;  %s634_s12 = smov 8  }
  0x12   :  { %36 = dma.hbm_to_vmem [thread:$0]  %s771_s1, 256, %s31_s25, [#allocation5], %s633_s11, %s633_s11, %s634_s12  }
  0x13   :  { %s635_s15 = smov [#allocation2]   ;;  %s636_s17 = smov [#allocation6]  }
  0x14   :  { %s21_s16 = sshll.u32 %s635_s15, 4  ;;  %s44_s18 = sshll.u32 %s636_s17, 4  ;;  %s22_s16 = int_to_ptr.vmem [resolvable:$true] %s21_s16  ;;  %s45_s18 = int_to_ptr.vmem [resolvable:$true] %s44_s18 }
  0x15   :  { %s560_s21 = scalar_lea.hbm %s770_s0, 128 }
  0x16   :  { %p561_p8 = scmp.ne.s32.totalorder %s770_s0, %s560_s21  ;;  %p564_p9 = scmp.lt.u32.totalorder %s560_s21, %s770_s0 }
  0x18   :  { %p566_p10 = pnand %p564_p9, %p561_p8 }
  0x1a   :  { %569 = shalt.err (!%p566_p10)
}
  0x1b   :  { %s570_s1 = scalar_lea.vmem %s22_s16, 128  ;;  %p575_p12 = scmp.lt.s32.totalorder %s22_s16, %s22_s16 }
  0x1c   :  { %p571_p11 = scmp.ne.s32.totalorder %s22_s16, %s570_s1  ;;  %p576_p13 = scmp.lt.s32.totalorder %s570_s1, %s570_s1 }
  0x1e   :  { %p577_p0 = por %p576_p13, %p575_p12 }
  0x20   :  { %p578_p1 = pnand %p577_p0, %p571_p11 }
  0x22   :  { %581 = shalt.err (!%p578_p1)
}
  0x23   :  { %24 = dma.hbm_to_vmem [thread:$0]  %s770_s0, 128, %s22_s16, [#allocation3]  }
  0x24   :  { %s582_s30 = scalar_lea.hbm %s773_s3, 2048 }
  0x25   :  { %p583_p2 = scmp.ne.s32.totalorder %s773_s3, %s582_s30  ;;  %p586_p3 = scmp.lt.u32.totalorder %s582_s30, %s773_s3 }
  0x27   :  { %p588_p4 = pnand %p586_p3, %p583_p2 }
  0x29   :  { %591 = shalt.err (!%p588_p4)
}
  0x2a   :  { %s592_s14 = scalar_lea.vmem %s45_s18, 2048  ;;  %p597_p6 = scmp.lt.s32.totalorder %s45_s18, %s45_s18 }
  0x2b   :  { %p593_p5 = scmp.ne.s32.totalorder %s45_s18, %s592_s14  ;;  %p598_p7 = scmp.lt.s32.totalorder %s592_s14, %s592_s14 }
  0x2d   :  { %p599_p8 = por %p598_p7, %p597_p6 }
  0x2f   :  { %p600_p9 = pnand %p599_p8, %p593_p5 }
  0x31   :  { %603 = shalt.err (!%p600_p9)
}
  0x32   :  { %50 = dma.hbm_to_vmem [thread:$0]  %s773_s3, 2048, %s45_s18, [#allocation5], %s633_s11, %s633_s11, %s634_s12  }
  0x33   :  { %s637_s16 = smov [#allocation7]   ;;  %s604_s21 = scalar_lea.hbm %s775_s5, 2048 }
  0x34   :  { %s58_s17 = sshll.u32 %s637_s16, 4  ;;  %p605_p10 = scmp.ne.s32.totalorder %s775_s5, %s604_s21  ;;  %s59_s17 = int_to_ptr.vmem [resolvable:$true] %s58_s17 }
  0x35   :  { %p608_p11 = scmp.lt.u32.totalorder %s604_s21, %s775_s5 }
  0x37   :  { %p610_p12 = pnand %p608_p11, %p605_p10 }
  0x39   :  { %613 = shalt.err (!%p610_p12)
}
  0x3a   :  { %s614_s1 = scalar_lea.vmem %s59_s17, 2048  ;;  %p619_p0 = scmp.lt.s32.totalorder %s59_s17, %s59_s17 }
  0x3b   :  { %p615_p13 = scmp.ne.s32.totalorder %s59_s17, %s614_s1  ;;  %p620_p1 = scmp.lt.s32.totalorder %s614_s1, %s614_s1 }
  0x3d   :  { %p621_p2 = por %p620_p1, %p619_p0 }
  0x3f   :  { %p622_p3 = pnand %p621_p2, %p615_p13 }
  0x41   :  { %625 = shalt.err (!%p622_p3)
}
  0x42   :  { %64 = dma.hbm_to_vmem [thread:$0]  %s775_s5, 2048, %s59_s17, [#allocation8], %s633_s11, %s633_s11, %s634_s12  }
  0x43   :  { %626 = dma.done.wait [#allocation3], 128  }
  0x44   :  { %627 = vsyncadd [#allocation3], 4294967168 }
  0x45   :  { %628 = dma.done.wait [#allocation5], 2304  }
  0x46   :  { %629 = vsyncadd [#allocation5], 4294964992 }
  0x47   :  { %630 = dma.done.wait [#allocation8], 2048  }
  0x48   :  { %631 = vsyncadd [#allocation8], 4294965248  ;;  %v638_v0 = vmov 0.0|0.0   ;;  %vm639_vm0 = vmmov 0   ;;  %v640_v1 = vmov 0.0   ;;  %v80_v2 = vld [vmem:[#allocation4] sm:$0xff] }
  0x49   :  { %478 = vmatprep.subr.bf16.mxu0 %v638_v0  ;;  %405 = vmatprep.mubr.msk.f32.mxu0 %vm639_vm0, %v640_v1  ;;  %v81_v3 = vld [vmem:[#allocation4 + $0x8] sm:$0xff]  ;;  %v164_v5 = vld [vmem:[#allocation6] sm:$0xff]  ;;  %v165_v6 = vld [vmem:[#allocation6 + $0x8] sm:$0xff]  ;;  %vm89_vm1 = vcmask 130048   ;;  %vm351_vm2 = vcmask 31744  }
  0x4a   :  { %481 = vmatprep.subr.bf16.mxu1 %v638_v0  ;;  %440 = vmatprep.mubr.msk.f32.mxu1 %vm639_vm0, %v640_v1  ;;  %v479_v4 = vpack.c.bf16 %v81_v3, %v80_v2  ;;  %v166_v7 = vld [vmem:[#allocation6 + $0x10] sm:$0xff]  ;;  %v482_v8 = vpack.c.bf16 %v165_v6, %v164_v5  ;;  %v167_v9 = vld [vmem:[#allocation6 + $0x18] sm:$0xff]  ;;  %v79_v10 = vld [vmem:[#allocation2] sm:$0xff] }
  0x4b   :  { %v485_v11 = vpack.c.bf16 %v167_v9, %v166_v7  ;;  %v168_v12 = vld [vmem:[#allocation6 + $0x20] sm:$0xff]  ;;  %v169_v13 = vld [vmem:[#allocation6 + $0x28] sm:$0xff]  ;;  %v170_v15 = vld [vmem:[#allocation6 + $0x30] sm:$0xff] }
  0x4c   :  { %480 = vmatpush3.bf16.msra.mxu0 %v479_v4  ;;  %483 = vmatpush3.bf16.msra.mxu1 %v482_v8  ;;  %v488_v14 = vpack.c.bf16 %v169_v13, %v168_v12  ;;  %v171_v16 = vld [vmem:[#allocation6 + $0x38] sm:$0xff]  ;;  %v172_v18 = vld [vmem:[#allocation6 + $0x40] sm:$0xff]  ;;  %v173_v19 = vld [vmem:[#allocation6 + $0x48] sm:$0xff] }
  0x4d   :  { %505 = vmatprep.subr.bf16.mxu0 %v638_v0  ;;  %484 = vmatprep.subr.bf16.mxu1 %v638_v0  ;;  %v491_v17 = vpack.c.bf16 %v171_v16, %v170_v15  ;;  %v494_v20 = vpack.c.bf16 %v173_v19, %v172_v18  ;;  %v174_v21 = vld [vmem:[#allocation6 + $0x50] sm:$0xff]  ;;  %v175_v22 = vld [vmem:[#allocation6 + $0x58] sm:$0xff]  ;;  %v176_v24 = vld [vmem:[#allocation6 + $0x60] sm:$0xff] }
  0x4e   :  { %v497_v23 = vpack.c.bf16 %v175_v22, %v174_v21  ;;  %v177_v25 = vld [vmem:[#allocation6 + $0x68] sm:$0xff]  ;;  %v178_v27 = vld [vmem:[#allocation6 + $0x70] sm:$0xff]  ;;  %v179_v28 = vld [vmem:[#allocation6 + $0x78] sm:$0xff] }
  0x4f   :  { %406 = vmatmul.mubr.msk.f32.vlgmr.msra.gmra.mrb[0].mxu0 %vm89_vm1, %v79_v10  ;;  %v500_v26 = vpack.c.bf16 %v177_v25, %v176_v24  ;;  %v503_v29 = vpack.c.bf16 %v179_v28, %v178_v27  ;;  %v258_v30 = vld [vmem:[#allocation7] sm:$0xff]  ;;  %v259_v31 = vld [vmem:[#allocation7 + $0x8] sm:$0xff]  ;;  %v260_v32 = vld [vmem:[#allocation7 + $0x10] sm:$0xff] }
  0x50   :  { %475 = vmatprep.mubr.msk.f32.mxu0 %vm639_vm0, %v640_v1  ;;  %486 = vmatpush3.bf16.msra.mxu1 %v485_v11  ;;  %v506_v33 = vpack.c.bf16 %v259_v31, %v258_v30  ;;  %v261_v34 = vld [vmem:[#allocation7 + $0x18] sm:$0xff]  ;;  %v262_v36 = vld [vmem:[#allocation7 + $0x20] sm:$0xff]  ;;  %v263_v37 = vld [vmem:[#allocation7 + $0x28] sm:$0xff] }
  0x51   :  { %487 = vmatprep.subr.bf16.mxu1 %v638_v0  ;;  %v509_v35 = vpack.c.bf16 %v261_v34, %v260_v32  ;;  %v512_v38 = vpack.c.bf16 %v263_v37, %v262_v36  ;;  %v264_v39 = vld [vmem:[#allocation7 + $0x30] sm:$0xff]  ;;  %v265_v40 = vld [vmem:[#allocation7 + $0x38] sm:$0xff]  ;;  %v266_v42 = vld [vmem:[#allocation7 + $0x40] sm:$0xff] }
  0x52   :  { %507 = vmatpush3.bf16.msra.mxu0 %v506_v33  ;;  %v515_v41 = vpack.c.bf16 %v265_v40, %v264_v39  ;;  %v267_v43 = vld [vmem:[#allocation7 + $0x48] sm:$0xff]  ;;  %v268_v45 = vld [vmem:[#allocation7 + $0x50] sm:$0xff]  ;;  %v269_v46 = vld [vmem:[#allocation7 + $0x58] sm:$0xff] }
  0x53   :  { %508 = vmatprep.subr.bf16.mxu0 %v638_v0  ;;  %v518_v44 = vpack.c.bf16 %v267_v43, %v266_v42  ;;  %v521_v47 = vpack.c.bf16 %v269_v46, %v268_v45  ;;  %v270_v48 = vld [vmem:[#allocation7 + $0x60] sm:$0xff]  ;;  %v271_v49 = vld [vmem:[#allocation7 + $0x68] sm:$0xff]  ;;  %v272_v56 = vld [vmem:[#allocation7 + $0x70] sm:$0xff] }
  0x54   :  { %489 = vmatpush3.bf16.msra.mxu1 %v488_v14  ;;  %v524_v50 = vpack.c.bf16 %v271_v49, %v270_v48  ;;  %v360_v51 = vld [vmem:[%s772_s2] ss:$0 sm:$0xff]  ;;  %v273_v57 = vld [vmem:[#allocation7 + $0x78] sm:$0xff] }
  0x55   :  { %490 = vmatprep.subr.bf16.mxu1 %v638_v0  ;;  %v527_v58 = vpack.c.bf16 %v273_v57, %v272_v56  ;;  %v362_v59 = vld [vmem:[%s774_s4] ss:$0 sm:$0xff] }
  0x56   :  { %510 = vmatpush3.bf16.msra.mxu0 %v509_v35 }
  0x57   :  { %511 = vmatprep.subr.bf16.mxu0 %v638_v0 }
  0x58   :  { %492 = vmatpush3.bf16.msra.mxu1 %v491_v17 }
  0x59   :  { %493 = vmatprep.subr.bf16.mxu1 %v638_v0 }
  0x5a   :  { %513 = vmatpush3.bf16.msra.mxu0 %v512_v38 }
  0x5b   :  { %514 = vmatprep.subr.bf16.mxu0 %v638_v0 }
  0x5c   :  { %495 = vmatpush3.bf16.msra.mxu1 %v494_v20 }
  0x5d   :  { %496 = vmatprep.subr.bf16.mxu1 %v638_v0 }
  0x5e   :  { %516 = vmatpush3.bf16.msra.mxu0 %v515_v41 }
  0x5f   :  { %517 = vmatprep.subr.bf16.mxu0 %v638_v0 }
  0x60   :  { %498 = vmatpush3.bf16.msra.mxu1 %v497_v23 }
  0x61   :  { %499 = vmatprep.subr.bf16.mxu1 %v638_v0 }
  0x62   :  { %519 = vmatpush3.bf16.msra.mxu0 %v518_v44 }
  0x63   :  { %520 = vmatprep.subr.bf16.mxu0 %v638_v0 }
  0x64   :  { %501 = vmatpush3.bf16.msra.mxu1 %v500_v26 }
  0x65   :  { %502 = vmatprep.subr.bf16.mxu1 %v638_v0 }
  0x66   :  { %522 = vmatpush3.bf16.msra.mxu0 %v521_v47 }
  0x67   :  { %523 = vmatprep.subr.bf16.mxu0 %v638_v0 }
  0x68   :  { %504 = vmatpush3.bf16.msra.mxu1 %v503_v29 }
  0x6a   :  { %525 = vmatpush3.bf16.msra.mxu0 %v524_v50 }
  0x6b   :  { %526 = vmatprep.subr.bf16.mxu0 %v638_v0  ;;  %v363_v0 = vld [vmem:[%s776_s6] ss:$0 sm:$0xff] }
  0x6e   :  { %528 = vmatpush3.bf16.msra.mxu0 %v527_v58 }
 0x122   :  { %v159_v52 = vpop.f32.mrb[0].mxu0 }
 0x123   :  { %v160_v53 = vadd.f32 %v360_v51, %v159_v52  ;;  %v407_v54 = vpop.f32.mrb[1].mxu0 }
 0x125   :  { %v163_v55 = vmax.f32 %v160_v53, 0.0 }
 0x127   :  { %441 = vmatmul.mubr.f32.vlgmr.msra.gmra.mrb[0].mxu1 %v163_v55 }
 0x1fa   :  { %v253_v60 = vpop.f32.mrb[0].mxu1 }
 0x1fb   :  { %v254_v61 = vadd.f32 %v362_v59, %v253_v60  ;;  %v442_v62 = vpop.f32.mrb[1].mxu1 }
 0x1fd   :  { %v257_v63 = vmax.f32 %v254_v61, 0.0 }
 0x1ff   :  { %476 = vmatmul.mubr.f32.vlgmr.msra.gmra.mrb[2].mxu0 %v257_v63 }
 0x2d2   :  { %v347_v1 = vpop.f32.mrb[2].mxu0 }
 0x2d3   :  { %v348_v2 = vadd.f32 %v363_v0, %v347_v1  ;;  %v477_v3 = vpop.f32.mrb[3].mxu0 }
 0x2d5   :  { %352 = vst.msk [vmem:[%s777_s7] sm:$0xff] %vm351_vm2, %v348_v2 }
 0x2d6   :  { %357 = vsyncpa [#allocation3], 1 }
 0x2d7   :  { %358 = vsyncpa [#allocation5], 1 }
 0x2d8   :  { %359 = vsyncpa [#allocation8], 1 }

</bundles_post_ra>
